<compile_context>
chip_gen: v7x
topology: tpu7x:2x2x1
jax: 0.10.0
libtpu: 0.0.40
codegen_flags: <defaults>
</compile_context>

<pallas_src>
import jax
import jax.numpy as jnp
from jax.experimental import pallas as pl
from jax.experimental.pallas import tpu as pltpu

SCALE = 0.448

# ~2 MiB per tile; double-buffered in + out => ~8 MiB resident (sized for the
# most VMEM-constrained generation, v5e, and trivially safe on v6e / v7x).
_TILE_BYTES = 2 * 1024 * 1024
# Below this element count, launch overhead dominates -> plain fusable jnp.
_MIN_KERNEL_ELEMS = 1024


def _scale_kernel(x_ref, o_ref):
    # Pure VPU elementwise multiply.  The constant is applied in f32 and the
    # result cast back: a no-op for f32 and matches PyTorch opmath semantics
    # for low-precision dtypes (e.g. bf16).
    o_ref[...] = (x_ref[...] * jnp.float32(SCALE)).astype(o_ref.dtype)


def _pick_lane_width(n):
    """Largest lane-dense width (multiple of 128) dividing n, else None."""
    for lanes in (512, 256, 128):
        if n % lanes == 0:
            return lanes
    return None


def _scale_2d(x2d, donate_input=False):
    rows, lanes = x2d.shape
    itemsize = jnp.dtype(x2d.dtype).itemsize
    bytes_per_row = lanes * itemsize

    # Rows per tile: ~_TILE_BYTES per block, multiple of 8 (sublane quantum).
    tm_cap = max(8, (_TILE_BYTES // bytes_per_row) // 8 * 8)

    if rows <= tm_cap:
        if lanes % 128 == 0 and rows >= 16:
            # Split into 2 blocks so the "parallel" grid axis has work for
            # both of v7x's TensorCores.  Last block may be partial (masked).
            tm = (pl.cdiv(rows, 2) + 7) // 8 * 8
        else:
            tm = rows  # single block == full array dims (valid for any rows)
    else:
        tm = tm_cap

    grid_rows = pl.cdiv(rows, tm)  # no grid padding: last block is partial

    kwargs = {}
    if donate_input:
        kwargs["input_output_aliases"] = {0: 0}

    return pl.pallas_call(
        _scale_kernel,
        out_shape=jax.ShapeDtypeStruct((rows, lanes), x2d.dtype),
        grid_spec=pltpu.PrefetchScalarGridSpec(
            num_scalar_prefetch=0,
            grid=(grid_rows,),
            in_specs=[pl.BlockSpec((tm, lanes), lambda i: (i, 0))],
            out_specs=pl.BlockSpec((tm, lanes), lambda i: (i, 0)),
        ),
        compiler_params=pltpu.CompilerParams(
            # Elementwise, no reduction: "parallel" lets v7x shard the grid
            # across both TensorCores; harmless on v5e/v6e.
            dimension_semantics=("parallel",),
        ),
        cost_estimate=pl.CostEstimate(
            flops=rows * lanes,
            bytes_accessed=2 * rows * lanes * itemsize,
            transcendentals=0,
        ),
        **kwargs,
    )(x2d)


def unsqueeze_mul(x, donate_input=False):
    """x: (B, H, W) -> (B, 1, H, W) with value x * 0.448 (== M.forward)."""
    B, H, W = x.shape
    n = B * H * W

    # Tiny tensors: let XLA fuse the scale into producers/consumers.  (In a
    # real model this threshold could be raised much higher for the same
    # reason -- the op is pure HBM roofline.)
    if n < _MIN_KERNEL_ELEMS:
        return (jnp.expand_dims(x, 1) * jnp.float32(SCALE)).astype(x.dtype)

    lanes = _pick_lane_width(n)
    if lanes is not None:
        # Lane-dense view: every store is a full, unmasked 128-lane vst.
        x2d = x.reshape(n // lanes, lanes)   # metadata-only reshape
    else:
        # Ragged total size: keep the original trailing axis as the lane
        # axis.  Stores may be lane-masked (W % 128 != 0), but there is no
        # pad / slice copy -- still exactly one HBM read + one HBM write.
        x2d = x.reshape(B * H, W)            # metadata-only reshape

    out2d = _scale_2d(x2d, donate_input=donate_input)
    # torch.unsqueeze(x, 1) is metadata-only -> plain reshape in the wrapper.
    return out2d.reshape(B, 1, H, W)


if __name__ == "__main__":
    key = jax.random.PRNGKey(0)

    test_shapes = [
        (1, 224, 224),  # canonical module input: 50176 = 98*512 -> lane-dense, 2-block grid
        (2, 512, 512),  # larger lane-dense case: two 1 MiB tiles, pipelined
        (3, 17, 29),    # ragged total size: direct (B*H, W) path, no pad/slice
        (1, 4, 64),     # tiny: fused plain-jnp fallback (no kernel launch)
    ]

    for (B, H, W) in test_shapes:
        key, sub = jax.random.split(key)
        x = jax.random.normal(sub, (B, H, W), dtype=jnp.float32)

        out = jax.block_until_ready(unsqueeze_mul(x))

        ref = jnp.expand_dims(x, 1) * SCALE
        assert out.shape == (B, 1, H, W), (out.shape, (B, 1, H, W))
        assert out.dtype == jnp.float32
        assert jnp.allclose(out, ref, atol=1e-6, rtol=1e-6), f"mismatch on {(B, H, W)}"

    print("KERNEL_OK")
</pallas_src>

<mosaic_0001>
module attributes {stable_mosaic.version = 11 : i64} {
  func.func @_scale_kernel(%arg0: i32, %arg1: memref<56x512xf32, #tpu.memory_space<vmem>>, %arg2: memref<56x512xf32, #tpu.memory_space<vmem>>) attributes {dimension_semantics = [#tpu.dimension_semantics<parallel>], iteration_bounds = array<i64: 2>, scalar_prefetch = 0 : i64, scratch_operands = 0 : i64, tpu.core_type = #tpu.core_type<tc>, window_params = [{transform_indices = @transform_0, window_bounds = array<i64: 56, 512>}, {transform_indices = @transform_1, window_bounds = array<i64: 56, 512>}]} {
    %c0 = arith.constant 0 : index
    %c0_0 = arith.constant 0 : index
    %0 = vector.load %arg1[%c0, %c0_0] : memref<56x512xf32, #tpu.memory_space<vmem>>, vector<56x512xf32>
    %cst = arith.constant 4.480000e-01 : f32
    %1 = vector.broadcast %cst : f32 to vector<56x512xf32>
    %2 = arith.mulf %0, %1 : vector<56x512xf32>
    %c0_1 = arith.constant 0 : index
    %c0_2 = arith.constant 0 : index
    %3 = vector.load %arg2[%c0_1, %c0_2] : memref<56x512xf32, #tpu.memory_space<vmem>>, vector<56x512xf32>
    tpu.vector_store %arg2[%c0_1, %c0_2], %2 {strides = array<i32>} : memref<56x512xf32, #tpu.memory_space<vmem>>, vector<56x512xf32>,
    return
  }
  func.func @transform_0(%arg0: i32) -> (i32, i32) {
    %c0_i32 = arith.constant 0 : i32
    %c0_i32_0 = arith.constant 0 : i32
    return %arg0, %c0_i32 : i32, i32
  }
  func.func @transform_1(%arg0: i32) -> (i32, i32) {
    %c0_i32 = arith.constant 0 : i32
    %c0_i32_0 = arith.constant 0 : i32
    return %arg0, %c0_i32 : i32, i32
  }
}

</mosaic_0001>

<bundles_post_ra>
// kernel: tpu_custom_call.1
= control target key start
LH: loop header
LB: loop body
LE: loop exit
PB: predicated region body
PF: predicated region fallthrough
CT: control target
= control target key end

     0   :  { %6 = vsyncpa [#allocation3], 0  ;;  %s750_s0 = inlined_call_operand.hbm [shape: f32[98,512], index: 0, kind: input, shape index: {}]   ;;  %s751_s1 = inlined_call_operand.hbm [shape: f32[98,512], index: 1, kind: output, shape index: {}]  }
   0x1   :  { %8 = vsyncpa [#allocation3 + $0x1], 0 }
   0x2   :  { %9 = vsyncpa [#allocation4], 0 }
   0x3   :  { %11 = vsyncpa [#allocation4 + $0x1], 0  ;;  %s519_s6 = smov 0   ;;  %s521_s7 = smov 0  }
   0x4   :  { %s523_s8 = smov 0   ;;  %s525_s9 = smov 0  }
   0x5 LB: > { %s540_s10 = sadd.s32 4294967295, %s501_s9   ;;  %s334_s11 = sadd.s32 4294967294, %s501_s9   ;;  %s501_s9 = sphi %s525_s9, %s761_s9   ;;  %s497_s8 = sphi %s523_s8, %s760_s8   ;;  %s493_s7 = sphi %s521_s7, %s759_s7   ;;  %s489_s6 = sphi %s519_s6, %s758_s6  }
   0x6   : > { %s544_s12 = sadd.s32 1, %s501_s9   ;;  %s24_s13 = sadd.s32 1, %s497_s8 }
   0x7   : > { %s21_s14 = ssub.s32 %s501_s9, %s544_s12  ;;  %p31_p0 = scmp.ne.s32.totalorder %s497_s8, %s493_s7 }
   0x8   : > { %p22_p1 = scmp.eq.s32.totalorder %s21_s14, 0  ;;  %p32_p2 = scmp.eq.s32.totalorder %s501_s9, 0 }
   0x9   : > { %p37_p3 = scmp.ne.s32.totalorder %s493_s7, %s489_s6  ;;  %p38_p4 = scmp.eq.s32.totalorder %s540_s10, 0 }
   0xa   : > { %s556_s15 = scalar_select %p22_p1, %s497_s8, %s24_s13  }
   0xb   : > { %p33_p5 = por %p32_p2, %p31_p0  ;;  %p558_p6 = por %p38_p4, %p37_p3 }
   0xc   : > { %p61_p7 = scmp.eq.s32.totalorder %s540_s10, 1  ;;  %p67_p8 = scmp.eq.s32.totalorder %s334_s11, 1 }
   0xd   : > { %p752_p11 = scmp.ge.s32.totalorder %s501_s9, 2 }
   0xe   : > { %p563_p9 = por %p61_p7, %p31_p0  ;;  %p567_p10 = por %p67_p8, %p37_p3 }
   0xf   : > { %83 = sbr.rel (%p752_p11) target bundleno = 57 (0x39), region = 16 }
  0x10   : > { %s755_s18 = scalar_select %p567_p10, 1, 0 }
  0x16   : > { %86 = sbr.rel (!%p33_p5) target bundleno = 57 (0x39), region = 20  ;;  %s87_s19 = sand.u32 (%p33_p5), 1, %s497_s8  }
  0x17   : > { %s92_s20 = smul.u32 (%p33_p5), 7, %s501_s9  ;;  %s579_s25 = scalar_lea.sflag (%p33_p5), [#allocation3], %s87_s19 }
  0x18   : > { %s362_s21 = smul.u32 (%p33_p5), 224, %s87_s19 }
  0x19   : > { %s93_s22 = ssub.s32 (%p33_p5), 13, %s92_s20 }
  0x1a   : > { %p94_p12 = scmp.lt.s32.totalorder (%p33_p5), %s93_s22, 7  ;;  %s91_s26 = scalar_lea.vmem (%p33_p5), [#allocation2], %s362_s21 }
  0x1d   : > { %s763_s22 = smov (!%p94_p12, %s93_s22), 7 }
  0x1e   : > { %s576_s23 = sshll.u32 %s763_s22, 9 }
  0x1f   : > { %s99_s24 = ssub.s32 3584, %s576_s23 }
  0x20   : > { %100 = vsyncadd %s579_s25, %s99_s24  ;;  %p339_p13 = scmp.ne.s32.totalorder %s576_s23, 0  ;;  %s360_s27 = smul.u32 3584, %s501_s9 }
  0x21   : > { %s106_s28 = sshll.u32 %s91_s26, 4  ;;  %s411_s11 = scalar_lea.hbm %s750_s0, 6656  ;;  %s589_s28 = int_to_ptr.vmem [resolvable:$true] %s106_s28 }
  0x22   : > { %s587_s2 = scalar_lea.hbm %s750_s0, %s360_s27 }
  0x23   : > { %s407_s3 = scalar_lea.hbm %s587_s2, %s576_s23  ;;  %p412_p3 = scmp.lt.u32.totalorder %s587_s2, %s750_s0 }
  0x24   : > { %p408_p0 = scmp.ne.s32.totalorder %s587_s2, %s407_s3  ;;  %p413_p4 = scmp.lt.u32.totalorder %s411_s11, %s407_s3 }
  0x25   : > { %p415_p7 = scmp.lt.u32.totalorder %s407_s3, %s587_s2 }
  0x26   : > { %p409_p1 = pnand %p408_p0, %p339_p13  ;;  %p414_p5 = por %p413_p4, %p412_p3 }
  0x28   : > { %p410_p2 = pneg %p409_p1  ;;  %p416_p8 = por %p415_p7, %p414_p5 }
  0x2a   : > { %p417_p12 = pnand %p416_p8, %p410_p2 }
  0x2c   : > { %420 = shalt.err (!%p417_p12)
}
  0x2d   : > { %s421_s19 = scalar_lea.vmem %s589_s28, %s576_s23  ;;  %s503_s20 = smov [#allocation2]  }
  0x2e   : > { %p422_p0 = scmp.ne.s32.totalorder %s589_s28, %s421_s19  ;;  %s425_s21 = sshll.u32 %s503_s20, 4  ;;  %s426_s21 = int_to_ptr.vmem [resolvable:$false] %s425_s21 }
  0x2f   : > { %s427_s22 = scalar_lea.vmem %s426_s21, 7168  ;;  %p428_p10 = scmp.lt.s32.totalorder %s589_s28, %s426_s21 }
  0x30   : > { %p423_p1 = pnand %p422_p0, %p339_p13  ;;  %p429_p3 = scmp.lt.s32.totalorder %s427_s22, %s421_s19 }
  0x32   : > { %p424_p11 = pneg %p423_p1  ;;  %p430_p4 = por %p429_p3, %p428_p10 }
  0x34   : > { %p431_p5 = pnand %p430_p4, %p424_p11 }
  0x36   : > { %434 = shalt.err (!%p431_p5)
}
  0x37   : > { %s504_s24 = smov 512   ;;  %s505_s26 = smov 32  }
  0x38   : > { %112 = dma.hbm_to_vmem [thread:$0]  (%p339_p13), %s587_s2, %s576_s23, %s589_s28, %s579_s25, %s504_s24, %s504_s24, %s505_s26  }
  0x39 PF: > { %p344_p2 = scmp.ge.s32.totalorder %s501_s9, 1  ;;  %p114_p7 = scmp.lt.s32.totalorder %s501_s9, 3 }
  0x3b   : > { %p115_p8 = pnand %p344_p2, %p114_p7 }
  0x3c   : > { %s619_s27 = sand.u32 (!%p115_p8), 1, %s493_s7  }
  0x3d   : > { %118 = sbr.rel (%p115_p8) target bundleno = 122 (0x7a), region = 24  ;;  %s121_s30 = scalar_lea.sflag (!%p115_p8), [#allocation3], %s619_s27 }
  0x3e   : > { %s363_s29 = smul.u32 (!%p115_p8), 224, %s619_s27 }
  0x40   : > { %s623_s3 = scalar_lea.vmem (!%p115_p8), [#allocation2], %s363_s29 }
  0x44   : > { %480 = dma.done.wait (%p558_p6), %s121_s30, 3584  }
  0x45   : > { %482 = vsyncadd (%p558_p6), %s121_s30, 4294963712  ;;  %v155_v0 = vld [vmem:[%s623_s3] sm:$0xff]  ;;  %v156_v1 = vld [vmem:[%s623_s3 + $0x8] sm:$0xff]  ;;  %s635_s16 = scalar_lea.vmem [#allocation5], %s363_s29  ;;  %s240_s23 = scalar_lea.sflag [#allocation4], %s619_s27 }
  0x46   : > { %v157_v2 = vld [vmem:[%s623_s3 + $0x10] sm:$0xff]  ;;  %v183_v3 = vmul.f32 0.448, %v155_v0  ;;  %v184_v4 = vmul.f32 0.448, %v156_v1  ;;  %v158_v6 = vld [vmem:[%s623_s3 + $0x18] sm:$0xff] }
  0x47   : > { %v185_v5 = vmul.f32 0.448, %v157_v2  ;;  %v159_v7 = vld [vmem:[%s623_s3 + $0x20] sm:$0xff]  ;;  %v160_v8 = vld [vmem:[%s623_s3 + $0x28] sm:$0xff]  ;;  %v186_v9 = vmul.f32 0.448, %v158_v6 }
  0x48   : > { %211 = vst [vmem:[%s635_s16] sm:$0xff] %v183_v3  ;;  %212 = vst [vmem:[%s635_s16 + $0x8] sm:$0xff] %v184_v4  ;;  %v187_v10 = vmul.f32 0.448, %v159_v7  ;;  %v188_v11 = vmul.f32 0.448, %v160_v8  ;;  %v161_v12 = vld [vmem:[%s623_s3 + $0x30] sm:$0xff] }
  0x49   : > { %213 = vst [vmem:[%s635_s16 + $0x10] sm:$0xff] %v185_v5  ;;  %v162_v13 = vld [vmem:[%s623_s3 + $0x38] sm:$0xff]  ;;  %v163_v14 = vld [vmem:[%s623_s3 + $0x40] sm:$0xff]  ;;  %214 = vst [vmem:[%s635_s16 + $0x18] sm:$0xff] %v186_v9  ;;  %v189_v15 = vmul.f32 0.448, %v161_v12 }
  0x4a   : > { %215 = vst [vmem:[%s635_s16 + $0x20] sm:$0xff] %v187_v10  ;;  %216 = vst [vmem:[%s635_s16 + $0x28] sm:$0xff] %v188_v11  ;;  %v190_v16 = vmul.f32 0.448, %v162_v13  ;;  %v191_v17 = vmul.f32 0.448, %v163_v14 }
  0x4b   : > { %v164_v18 = vld [vmem:[%s623_s3 + $0x48] sm:$0xff]  ;;  %v165_v19 = vld [vmem:[%s623_s3 + $0x50] sm:$0xff]  ;;  %v166_v20 = vld [vmem:[%s623_s3 + $0x58] sm:$0xff]  ;;  %217 = vst [vmem:[%s635_s16 + $0x30] sm:$0xff] %v189_v15  ;;  %s247_s25 = smul.u32 (%p563_p9), 7, %s540_s10 }
  0x4c   : > { %218 = vst [vmem:[%s635_s16 + $0x38] sm:$0xff] %v190_v16  ;;  %219 = vst [vmem:[%s635_s16 + $0x40] sm:$0xff] %v191_v17  ;;  %v192_v21 = vmul.f32 0.448, %v164_v18  ;;  %v193_v22 = vmul.f32 0.448, %v165_v19 }
  0x4d   : > { %v194_v23 = vmul.f32 0.448, %v166_v20  ;;  %v167_v24 = vld [vmem:[%s623_s3 + $0x60] sm:$0xff]  ;;  %v168_v25 = vld [vmem:[%s623_s3 + $0x68] sm:$0xff]  ;;  %v169_v26 = vld [vmem:[%s623_s3 + $0x70] sm:$0xff]  ;;  %s248_s28 = ssub.s32 (%p563_p9), 13, %s247_s25 }
  0x4e   : > { %220 = vst [vmem:[%s635_s16 + $0x48] sm:$0xff] %v192_v21  ;;  %221 = vst [vmem:[%s635_s16 + $0x50] sm:$0xff] %v193_v22  ;;  %v195_v27 = vmul.f32 0.448, %v167_v24  ;;  %v196_v28 = vmul.f32 0.448, %v168_v25 }
  0x4f   : > { %222 = vst [vmem:[%s635_s16 + $0x58] sm:$0xff] %v194_v23  ;;  %v197_v29 = vmul.f32 0.448, %v169_v26  ;;  %v170_v30 = vld [vmem:[%s623_s3 + $0x78] sm:$0xff]  ;;  %v171_v31 = vld [vmem:[%s623_s3 + $0x80] sm:$0xff]  ;;  %v172_v32 = vld [vmem:[%s623_s3 + $0x88] sm:$0xff] }
  0x50   : > { %223 = vst [vmem:[%s635_s16 + $0x60] sm:$0xff] %v195_v27  ;;  %224 = vst [vmem:[%s635_s16 + $0x68] sm:$0xff] %v196_v28  ;;  %v198_v33 = vmul.f32 0.448, %v170_v30  ;;  %v199_v34 = vmul.f32 0.448, %v171_v31 }
  0x51   : > { %225 = vst [vmem:[%s635_s16 + $0x70] sm:$0xff] %v197_v29  ;;  %v200_v35 = vmul.f32 0.448, %v172_v32  ;;  %v173_v36 = vld [vmem:[%s623_s3 + $0x90] sm:$0xff]  ;;  %v174_v37 = vld [vmem:[%s623_s3 + $0x98] sm:$0xff]  ;;  %v175_v38 = vld [vmem:[%s623_s3 + $0xa0] sm:$0xff] }
  0x52   : > { %226 = vst [vmem:[%s635_s16 + $0x78] sm:$0xff] %v198_v33  ;;  %227 = vst [vmem:[%s635_s16 + $0x80] sm:$0xff] %v199_v34  ;;  %v201_v39 = vmul.f32 0.448, %v173_v36  ;;  %v202_v40 = vmul.f32 0.448, %v174_v37 }
  0x53   : > { %228 = vst [vmem:[%s635_s16 + $0x88] sm:$0xff] %v200_v35  ;;  %v203_v41 = vmul.f32 0.448, %v175_v38  ;;  %v176_v42 = vld [vmem:[%s623_s3 + $0xa8] sm:$0xff]  ;;  %v177_v43 = vld [vmem:[%s623_s3 + $0xb0] sm:$0xff]  ;;  %v178_v44 = vld [vmem:[%s623_s3 + $0xb8] sm:$0xff] }
  0x54   : > { %229 = vst [vmem:[%s635_s16 + $0x90] sm:$0xff] %v201_v39  ;;  %230 = vst [vmem:[%s635_s16 + $0x98] sm:$0xff] %v202_v40  ;;  %v204_v45 = vmul.f32 0.448, %v176_v42  ;;  %v205_v46 = vmul.f32 0.448, %v177_v43 }
  0x55   : > { %231 = vst [vmem:[%s635_s16 + $0xa0] sm:$0xff] %v203_v41  ;;  %v206_v47 = vmul.f32 0.448, %v178_v44  ;;  %v179_v48 = vld [vmem:[%s623_s3 + $0xc0] sm:$0xff]  ;;  %v180_v49 = vld [vmem:[%s623_s3 + $0xc8] sm:$0xff]  ;;  %v181_v50 = vld [vmem:[%s623_s3 + $0xd0] sm:$0xff] }
  0x56   : > { %232 = vst [vmem:[%s635_s16 + $0xa8] sm:$0xff] %v204_v45  ;;  %233 = vst [vmem:[%s635_s16 + $0xb0] sm:$0xff] %v205_v46  ;;  %v207_v51 = vmul.f32 0.448, %v179_v48  ;;  %v208_v52 = vmul.f32 0.448, %v180_v49 }
  0x57   : > { %234 = vst [vmem:[%s635_s16 + $0xb8] sm:$0xff] %v206_v47  ;;  %v209_v53 = vmul.f32 0.448, %v181_v50  ;;  %v182_v54 = vld [vmem:[%s623_s3 + $0xd8] sm:$0xff]  ;;  %246 = sbr.rel (!%p563_p9) target bundleno = 122 (0x7a), region = 32  ;;  %p249_p6 = scmp.lt.s32.totalorder (%p563_p9), %s248_s28, 7 }
  0x58   : > { %235 = vst [vmem:[%s635_s16 + $0xc0] sm:$0xff] %v207_v51  ;;  %236 = vst [vmem:[%s635_s16 + $0xc8] sm:$0xff] %v208_v52  ;;  %v210_v55 = vmul.f32 0.448, %v182_v54 }
  0x59   : > { %237 = vst [vmem:[%s635_s16 + $0xd0] sm:$0xff] %v209_v53 }
  0x5a   : > { %238 = vst [vmem:[%s635_s16 + $0xd8] sm:$0xff] %v210_v55 }
  0x5e   : > { %s765_s28 = smov (!%p249_p6, %s248_s28), 7 }
  0x5f   : > { %s691_s2 = sshll.u32 %s765_s28, 9 }
  0x60   : > { %s254_s4 = ssub.s32 3584, %s691_s2 }
  0x61   : > { %255 = vsyncadd %s240_s23, %s254_s4  ;;  %p347_p10 = scmp.ne.s32.totalorder %s691_s2, 0  ;;  %s361_s17 = smul.u32 3584, %s540_s10 }
  0x62   : > { %s261_s5 = sshll.u32 %s635_s16, 4  ;;  %s506_s20 = smov [#allocation5]   ;;  %s704_s5 = int_to_ptr.vmem [resolvable:$true] %s261_s5 }
  0x63   : > { %s702_s14 = scalar_lea.hbm %s751_s1, %s361_s17  ;;  %s435_s19 = scalar_lea.vmem %s704_s5, %s691_s2 }
  0x64   : > { %p436_p9 = scmp.ne.s32.totalorder %s704_s5, %s435_s19  ;;  %s439_s21 = sshll.u32 %s506_s20, 4  ;;  %s440_s21 = int_to_ptr.vmem [resolvable:$false] %s439_s21 }
  0x65   : > { %s441_s10 = scalar_lea.vmem %s440_s21, 7168  ;;  %p442_p12 = scmp.lt.s32.totalorder %s704_s5, %s440_s21 }
  0x66   : > { %p437_p11 = pnand %p436_p9, %p347_p10  ;;  %p443_p0 = scmp.lt.s32.totalorder %s441_s10, %s435_s19 }
  0x68   : > { %p438_p13 = pneg %p437_p11  ;;  %p444_p1 = por %p443_p0, %p442_p12 }
  0x6a   : > { %p445_p3 = pnand %p444_p1, %p438_p13 }
  0x6c   : > { %448 = shalt.err (!%p445_p3)
}
  0x6d   : > { %s449_s22 = scalar_lea.hbm %s702_s14, %s691_s2  ;;  %s453_s29 = scalar_lea.hbm %s751_s1, 6656 }
  0x6e   : > { %p450_p4 = scmp.ne.s32.totalorder %s702_s14, %s449_s22  ;;  %p454_p7 = scmp.lt.u32.totalorder %s702_s14, %s751_s1 }
  0x6f   : > { %p455_p8 = scmp.lt.u32.totalorder %s453_s29, %s449_s22  ;;  %p457_p9 = scmp.lt.u32.totalorder %s449_s22, %s702_s14 }
  0x70   : > { %p451_p5 = pnand %p450_p4, %p347_p10 }
  0x71   : > { %p456_p6 = por %p455_p8, %p454_p7 }
  0x72   : > { %p452_p2 = pneg %p451_p5 }
  0x73   : > { %p458_p11 = por %p457_p9, %p456_p6 }
  0x75   : > { %p459_p13 = pnand %p458_p11, %p452_p2 }
  0x77   : > { %462 = shalt.err (!%p459_p13)
}
  0x78   : > { %s507_s16 = smov 512   ;;  %s508_s25 = smov 32  }
  0x79   : > { %267 = dma.vmem_to_hbm [thread:$0]  (%p347_p10), %s704_s5, %s691_s2, %s702_s14, %s240_s23, %s507_s16, %s507_s16, %s508_s25  }
  0x7a PF: > { %s276_s28 = sand.u32 1, %s489_s6   ;;  %p756_p12 = scmp.ne.s32.totalorder %s755_s18, 0 }
  0x7b   : > { %p757_p0 = scmp.ge.s32.totalorder %s501_s9, 2  ;;  %s277_s4 = scalar_lea.sflag [#allocation4], %s276_s28 }
  0x7d   : > { %p367_p1 = pnand %p757_p0, %p756_p12 }
  0x7f   : > { %484 = dma.done.wait (!%p367_p1), %s277_s4, 3584  }
  0x80   : > { %486 = vsyncadd (!%p367_p1), %s277_s4, 4294963712  ;;  %p14_p3 = scmp.ge.s32.totalorder %s544_s12, 4   ;;  %s758_s6 = smov %s493_s7 }
  0x81   : > { %s759_s7 = smov %s497_s8  ;;  %s760_s8 = smov %s556_s15 }
  0x82   : > { %s761_s9 = smov %s544_s12  ;;  %16 = sbr.rel (!%p14_p3) target bundleno = 5 (0x5), region = 69 }
  0x89   :  { %282 = vsyncpa [#allocation3], 1 }
  0x8a   :  { %284 = vsyncpa [#allocation3 + $0x1], 1 }
  0x8b   :  { %285 = vsyncpa [#allocation4], 1 }
  0x8c   :  { %287 = vsyncpa [#allocation4 + $0x1], 1 }

</bundles_post_ra>
